<compile_context>
chip_gen: v6e
topology: v6e:2x2x1
jax: 0.10.0
libtpu: 0.0.40
codegen_flags: <defaults>
</compile_context>

<pallas_src>
import functools
import math

import jax
import jax.numpy as jnp
from jax.experimental import pallas as pl
from jax.experimental.pallas import tpu as pltpu

_LANE = 128
_MAX_SLAB_W = 2048  # widest lane-dense slab width we try when flattening


def _angle_loss_kernel(inv, cos_ref, phi_ref, out_ref):
    cos = cos_ref[...]
    phi = phi_ref[...]
    # index = (cos_theta * 0.0).bool(): all-False for finite inputs,
    # True where cos_theta is NaN/Inf (x*0 -> NaN, and NaN != 0 is True).
    mask = (cos * 0.0) != 0.0
    # output[index] = cos - cos*inv + phi*inv  ==  cos + (phi - cos) * inv
    out_ref[...] = jnp.where(mask, cos + (phi - cos) * inv, cos)


def _vmem_budget():
    """Generation-aware scoped-VMEM limit and live-tile budget (bytes)."""
    cap = 64 * 1024 * 1024  # safe default (v7x per-TC physical VMEM)
    try:
        info = pltpu.get_tpu_info()
        cap = int(getattr(info, "vmem_capacity_bytes", cap))
    except Exception:
        pass
    # 96 MiB on 128 MiB chips (v5e/v6e), 48 MiB on 64 MiB v7x.
    vmem_limit = min(96 * 1024 * 1024, (cap * 3) // 4)
    tile_budget = (vmem_limit * 3) // 4
    return vmem_limit, tile_budget


def angle_loss_predict(cos_theta, phi_theta, *, gamma=0, it=1,
                       lambda_min=5.0, lambda_max=1500.0):
    """Forward pass of AngleLoss_predict (gamma=0 path)."""
    assert cos_theta.shape == phi_theta.shape
    assert cos_theta.dtype == phi_theta.dtype
    del gamma  # unused in the forward pass (only the gamma=0 path exists)

    lamb = max(lambda_min, lambda_max / (1.0 + 0.1 * it))
    inv = 1.0 / (1.0 + lamb)

    orig_shape = cos_theta.shape
    dtype = cos_theta.dtype
    itemsize = jnp.dtype(dtype).itemsize
    # Minimum sublane quantum: 8 for f32, 16 for bf16, 32 for i8.
    sub_q = max(8, 32 // itemsize)

    N = math.prod(orig_shape)
    C = orig_shape[-1]

    # Pick a lane-dense 2-D view (R, W) with NO padding and NO copies:
    #   1) flatten to (N // W, W) for the widest W in {2048..128} dividing N;
    #   2) else keep (B, C); the block's last dim equals the full class dim.
    W = None
    for cand in (_MAX_SLAB_W, 1024, 512, 256, _LANE):
        if N % cand == 0:
            W = cand
            break
    if W is None:
        W = C
    R = N // W
    cos2 = cos_theta.reshape(R, W)
    phi2 = phi_theta.reshape(R, W)

    vmem_limit, tile_budget = _vmem_budget()
    per_buf = tile_budget // 6  # 2 inputs + 1 output, each double-buffered

    # Lane tile: full width by default; only tile the class axis when a single
    # sub_q-row full-width block would alone exceed the per-buffer budget
    # (huge, lane-unaligned class counts).
    if W % _LANE == 0 or sub_q * W * itemsize <= per_buf:
        TW = W
    else:
        TW = max(_LANE, (per_buf // (sub_q * itemsize)) // _LANE * _LANE)

    # Row tile: largest sublane-aligned count fitting the per-buffer budget.
    tb_max = max(sub_q, (per_buf // (TW * itemsize)) // sub_q * sub_q)
    if R <= sub_q:
        TB = R  # block dim equals the full array dim (allowed even if < 8)
    else:
        TB = min(tb_max, (R // sub_q) * sub_q)
        # Ensure >= 2 grid steps so v7x can shard across both TensorCores.
        if pl.cdiv(R, TB) * pl.cdiv(W, TW) < 2:
            half = pl.cdiv(pl.cdiv(R, 2), sub_q) * sub_q
            TB = max(sub_q, min(TB, half))

    grid = (pl.cdiv(R, TB), pl.cdiv(W, TW))
    kernel = functools.partial(_angle_loss_kernel, inv)

    out = pl.pallas_call(
        kernel,
        out_shape=jax.ShapeDtypeStruct((R, W), dtype),
        grid_spec=pl.GridSpec(
            grid=grid,
            in_specs=[
                pl.BlockSpec((TB, TW), lambda i, j: (i, j)),
                pl.BlockSpec((TB, TW), lambda i, j: (i, j)),
            ],
            out_specs=pl.BlockSpec((TB, TW), lambda i, j: (i, j)),
        ),
        compiler_params=pltpu.CompilerParams(
            dimension_semantics=("parallel", "parallel"),
            vmem_limit_bytes=vmem_limit,
        ),
    )(cos2, phi2)

    return out.reshape(orig_shape)


if __name__ == "__main__":
    key = jax.random.PRNGKey(0)
    k1, k2, k3, k4 = jax.random.split(key, 4)

    # Case 1: unaligned shapes (classes not a multiple of 128, rows not of 8)
    # -> (B, C) path with full-C blocks and a partial edge row block; no pads.
    B, C = 10, 40
    cos_theta = jax.random.uniform(k1, (B, C), jnp.float32, -1.0, 1.0)
    phi_theta = jax.random.uniform(k2, (B, C), jnp.float32, -2.0, 2.0)
    out = jax.block_until_ready(angle_loss_predict(cos_theta, phi_theta))
    assert out.shape == (B, C) and out.dtype == jnp.float32
    # Finite inputs -> all-False mask -> output == cos_theta exactly.
    assert jnp.array_equal(out, cos_theta)

    # Case 2: element count divisible by a wide lane width
    # -> flattened lane-dense (N//2048, 2048) slab, unmasked full-width stores.
    B2, C2 = 16, 256
    cos_b = jax.random.uniform(k3, (B2, C2), jnp.float32, -1.0, 1.0)
    phi_b = jax.random.uniform(k4, (B2, C2), jnp.float32, -2.0, 2.0)
    out_b = jax.block_until_ready(angle_loss_predict(cos_b, phi_b))
    assert out_b.shape == (B2, C2)
    assert jnp.array_equal(out_b, cos_b)

    # Case 3: non-finite cos_theta activates the index path
    # (PyTorch: Inf -> Inf - Inf*inv + phi*inv -> NaN).
    cos_c = cos_b.at[0, 0].set(jnp.inf)
    out_c = jax.block_until_ready(angle_loss_predict(cos_c, phi_b))
    assert bool(jnp.isnan(out_c[0, 0]))
    assert jnp.array_equal(out_c[0, 1:], cos_c[0, 1:])
    assert jnp.array_equal(out_c[1:], cos_c[1:])

    print("KERNEL_OK")
</pallas_src>

<mosaic_0001>
module attributes {stable_mosaic.version = 11 : i64} {
  func.func @_angle_loss_kernel(%arg0: i32, %arg1: i32, %arg2: memref<8x40xf32, #tpu.memory_space<vmem>>, %arg3: memref<8x40xf32, #tpu.memory_space<vmem>>, %arg4: memref<8x40xf32, #tpu.memory_space<vmem>>) attributes {dimension_semantics = [#tpu.dimension_semantics<parallel>, #tpu.dimension_semantics<parallel>], iteration_bounds = array<i64: 2, 1>, scalar_prefetch = 0 : i64, scratch_operands = 0 : i64, tpu.core_type = #tpu.core_type<tc>, window_params = [{transform_indices = @transform_0, window_bounds = array<i64: 8, 40>}, {transform_indices = @transform_1, window_bounds = array<i64: 8, 40>}, {transform_indices = @transform_2, window_bounds = array<i64: 8, 40>}]} {
    %c0 = arith.constant 0 : index
    %c0_0 = arith.constant 0 : index
    %0 = vector.load %arg2[%c0, %c0_0] : memref<8x40xf32, #tpu.memory_space<vmem>>, vector<8x40xf32>
    %c0_1 = arith.constant 0 : index
    %c0_2 = arith.constant 0 : index
    %1 = vector.load %arg3[%c0_1, %c0_2] : memref<8x40xf32, #tpu.memory_space<vmem>>, vector<8x40xf32>
    %cst = arith.constant 0.000000e+00 : f32
    %2 = vector.broadcast %cst : f32 to vector<8x40xf32>
    %3 = arith.mulf %0, %2 : vector<8x40xf32>
    %cst_3 = arith.constant 0.000000e+00 : f32
    %4 = vector.broadcast %cst_3 : f32 to vector<8x40xf32>
    %5 = arith.cmpf one, %3, %4 : vector<8x40xf32>
    %6 = arith.subf %1, %0 : vector<8x40xf32>
    %cst_4 = arith.constant 7.327960e-04 : f32
    %7 = vector.broadcast %cst_4 : f32 to vector<8x40xf32>
    %8 = arith.mulf %6, %7 : vector<8x40xf32>
    %9 = arith.addf %0, %8 : vector<8x40xf32>
    %10 = arith.select %5, %9, %0 : vector<8x40xi1>, vector<8x40xf32>
    %c0_5 = arith.constant 0 : index
    %c0_6 = arith.constant 0 : index
    %11 = vector.load %arg4[%c0_5, %c0_6] : memref<8x40xf32, #tpu.memory_space<vmem>>, vector<8x40xf32>
    tpu.vector_store %arg4[%c0_5, %c0_6], %10 {strides = array<i32>} : memref<8x40xf32, #tpu.memory_space<vmem>>, vector<8x40xf32>,
    return
  }
  func.func @transform_0(%arg0: i32, %arg1: i32) -> (i32, i32) {
    %c0_i32 = arith.constant 0 : i32
    return %arg0, %arg1 : i32, i32
  }
  func.func @transform_1(%arg0: i32, %arg1: i32) -> (i32, i32) {
    %c0_i32 = arith.constant 0 : i32
    return %arg0, %arg1 : i32, i32
  }
  func.func @transform_2(%arg0: i32, %arg1: i32) -> (i32, i32) {
    %c0_i32 = arith.constant 0 : i32
    return %arg0, %arg1 : i32, i32
  }
}

</mosaic_0001>

<bundles_post_ra>
// kernel: tpu_custom_call.1
= control target key start
LH: loop header
LB: loop body
LE: loop exit
PB: predicated region body
PF: predicated region fallthrough
CT: control target
= control target key end

     0   :  { %7 = vsyncpa [#allocation3], 0  ;;  %s755_s0 = inlined_call_operand.hbm [shape: f32[10,40], index: 0, kind: input, shape index: {}]   ;;  %s756_s1 = inlined_call_operand.hbm [shape: f32[10,40], index: 1, kind: input, shape index: {}]   ;;  %s757_s2 = inlined_call_operand.hbm [shape: f32[10,40], index: 2, kind: output, shape index: {}]  }
   0x1   :  { %9 = vsyncpa [#allocation3 + $0x1], 0 }
   0x2   :  { %10 = vsyncpa [#allocation6], 0 }
   0x3   :  { %12 = vsyncpa [#allocation6 + $0x1], 0 }
   0x4   :  { %13 = vsyncpa [#allocation4], 0 }
   0x5   :  { %15 = vsyncpa [#allocation4 + $0x1], 0  ;;  %s588_s9 = smov 0   ;;  %s590_s10 = smov 0  }
   0x6   :  { %s592_s11 = smov 0   ;;  %s594_s12 = smov 0  }
   0x7   :  { %s596_s13 = smov 0   ;;  %s598_s14 = smov 0  }
   0x8 LB: > { %s345_s15 = sadd.s32 4294967295, %s568_s14   ;;  %s346_s16 = sadd.s32 4294967294, %s568_s14   ;;  %s568_s14 = sphi %s598_s14, %s21_s14   ;;  %s564_s13 = sphi %s596_s13, %s769_s13   ;;  %s560_s12 = sphi %s594_s12, %s768_s12   ;;  %s556_s11 = sphi %s592_s11, %s767_s11   ;;  %s552_s10 = sphi %s590_s10, %s766_s10   ;;  %s548_s9 = sphi %s588_s9, %s765_s9  }
   0x9   : > { %s33_s17 = sadd.s32 1, %s564_s13  ;;  %s42_s18 = sadd.s32 1, %s556_s11 }
   0xa   : > { %p35_p0 = scmp.ge.s32.totalorder %s33_s17, 2  ;;  %p49_p1 = scmp.ne.s32.totalorder %s556_s11, %s552_s10 }
   0xb   : > { %p50_p2 = scmp.eq.s32.totalorder %s568_s14, 0  ;;  %p55_p3 = scmp.ne.s32.totalorder %s552_s10, %s548_s9 }
   0xc   : > { %s771_s17 = smov (%p35_p0, %s33_s17), 0  ;;  %p56_p5 = scmp.eq.s32.totalorder %s345_s15, 0 }
   0xd   : > { %p629_p4 = por %p50_p2, %p49_p1  ;;  %s37_s20 = ssub.s32 %s564_s13, %s771_s17 }
   0xe   : > { %p109_p6 = scmp.eq.s32.totalorder %s345_s15, 1  ;;  %p40_p7 = scmp.eq.s32.totalorder %s37_s20, 0 }
   0xf   : > { %p635_p8 = por %p56_p5, %p55_p3  ;;  %p115_p10 = scmp.eq.s32.totalorder %s346_s16, 1 }
  0x10   : > { %p639_p9 = por %p109_p6, %p49_p1  ;;  %p378_p13 = scmp.lt.s32.totalorder %s568_s14, 2 }
  0x11   : > { %s644_s23 = scalar_select %p40_p7, %s556_s11, %s42_s18  }
  0x12   : > { %p646_p11 = por %p115_p10, %p55_p3  ;;  %s653_s25 = sand.u32 1, %s556_s11  }
  0x13   : > { %s349_s26 = sshll.u32 %s653_s25, 3  ;;  %s350_s27 = sshll.u32 %s564_s13, 7 }
  0x14   : > { %s145_s30 = scalar_lea.hbm %s755_s0, %s350_s27  ;;  %s139_s3 = scalar_lea.vmem [#allocation2], %s349_s26 }
  0x15   : > { %s147_s4 = sshll.u32 %s139_s3, 4  ;;  %p662_p0 = pnand %p378_p13, %p629_p4  ;;  %s148_s4 = int_to_ptr.vmem [resolvable:$true] %s147_s4 }
  0x16   : > { %p353_p1 = scmp.ge.s32.totalorder %s568_s14, 1  ;;  %p171_p2 = scmp.lt.s32.totalorder %s568_s14, 3 }
  0x17   : > { %s136_s6 = scalar_lea.sflag [#allocation3], %s653_s25  ;;  %p430_p3 = pneg %p662_p0 }
  0x18   : > { %s441_s7 = scalar_lea.vmem %s148_s4, 128  ;;  %s570_s8 = smov [#allocation2]  }
  0x19   : > { %p442_p5 = scmp.ne.s32.totalorder %s148_s4, %s441_s7  ;;  %s446_s15 = sshll.u32 %s570_s8, 4  ;;  %s447_s15 = int_to_ptr.vmem [resolvable:$false] %s446_s15 }
  0x1a   : > { %s448_s16 = scalar_lea.vmem %s447_s15, 256  ;;  %p449_p4 = scmp.lt.s32.totalorder %s148_s4, %s447_s15 }
  0x1b   : > { %p444_p6 = pnand %p442_p5, %p430_p3  ;;  %p450_p10 = scmp.lt.s32.totalorder %s448_s16, %s441_s7 }
  0x1d   : > { %p445_p7 = pneg %p444_p6  ;;  %p451_p13 = por %p450_p10, %p449_p4 }
  0x1f   : > { %p452_p12 = pnand %p451_p13, %p445_p7 }
  0x21   : > { %455 = shalt.err (!%p452_p12)
}
  0x22   : > { %370 = dma.hbm_to_vmem [thread:$0]  (!%p662_p0), %s145_s30, 128, %s148_s4, %s136_s6  }
  0x23   : > { %p680_p5 = pnand %p353_p1, %p171_p2  ;;  %s164_s28 = scalar_lea.hbm %s756_s1, %s350_s27 }
  0x24   : > { %s158_s29 = scalar_lea.vmem [#allocation5], %s349_s26  ;;  %s155_s7 = scalar_lea.sflag [#allocation6], %s653_s25 }
  0x25   : > { %s166_s3 = sshll.u32 %s158_s29, 4  ;;  %s571_s30 = smov [#allocation5]   ;;  %s167_s3 = int_to_ptr.vmem [resolvable:$true] %s166_s3 }
  0x26   : > { %s469_s8 = scalar_lea.vmem %s167_s3, 128  ;;  %s474_s4 = sshll.u32 %s571_s30, 4  ;;  %s475_s4 = int_to_ptr.vmem [resolvable:$false] %s474_s4 }
  0x27   : > { %p470_p12 = scmp.ne.s32.totalorder %s167_s3, %s469_s8  ;;  %s476_s6 = scalar_lea.vmem %s475_s4, 256 }
  0x28   : > { %p477_p1 = scmp.lt.s32.totalorder %s167_s3, %s475_s4  ;;  %p478_p2 = scmp.lt.s32.totalorder %s476_s6, %s469_s8 }
  0x29   : > { %p472_p6 = pnand %p470_p12, %p430_p3 }
  0x2a   : > { %p479_p4 = por %p478_p2, %p477_p1 }
  0x2b   : > { %p473_p7 = pneg %p472_p6 }
  0x2d   : > { %p480_p10 = pnand %p479_p4, %p473_p7 }
  0x2f   : > { %483 = shalt.err (!%p480_p10)
}
  0x30   : > { %373 = dma.hbm_to_vmem [thread:$0]  (!%p662_p0), %s164_s28, 128, %s167_s3, %s155_s7  }
  0x31   : > { %175 = sbr.rel (%p680_p5) target bundleno = 81 (0x51), region = 28  ;;  %s696_s25 = sand.u32 (!%p680_p5), 1, %s552_s10  }
  0x32   : > { %s354_s26 = sshll.u32 (!%p680_p5), %s696_s25, 3  ;;  %s178_s27 = scalar_lea.sflag (!%p680_p5), [#allocation3], %s696_s25 }
  0x33   : > { %s181_s15 = scalar_lea.vmem (!%p680_p5), [#allocation2], %s354_s26 }
  0x36   : > { %535 = dma.done.wait (%p635_p8), %s178_s27, 128  }
  0x37   : > { %537 = vsyncadd (%p635_p8), %s178_s27, 4294967168  ;;  %s187_s5 = scalar_lea.sflag [#allocation6], %s696_s25  ;;  %s190_s16 = scalar_lea.vmem [#allocation5], %s354_s26 }
  0x38   : > { %539 = dma.done.wait (%p635_p8), %s187_s5, 128  }
  0x39   : > { %541 = vsyncadd (%p635_p8), %s187_s5, 4294967168  ;;  %v216_v0 = vld [vmem:[%s181_s15] sm:$0xff]  ;;  %v217_v1 = vld [vmem:[%s190_s16] sm:$0xff]  ;;  %s215_s18 = scalar_lea.vmem [#allocation7], %s354_s26  ;;  %s358_s20 = sshll.u32 %s560_s12, 7  ;;  %vm224_vm1 = vcmask 326656  }
  0x3a   : > { %v218_v2 = vmul.f32 0.0, %v216_v0  ;;  %v220_v3 = vsub.f32 %v217_v1, %v216_v0  ;;  %s241_s19 = sshll.u32 %s215_s18, 4  ;;  %s239_s21 = scalar_lea.hbm %s757_s2, %s358_s20  ;;  %s710_s19 = int_to_ptr.vmem [resolvable:$true] %s241_s19 }
  0x3b   : > { %s227_s3 = scalar_lea.sflag [#allocation4], %s696_s25  ;;  %s484_s7 = scalar_lea.vmem %s710_s19, 128 }
  0x3c   : > { %v221_v4 = vmul.f32 0.000732796, %v220_v3  ;;  %vm219_vm0 = vcmp.ne.f32.partialorder %v218_v2, 0.0  ;;  %p485_p8 = scmp.ne.s32.totalorder %s710_s19, %s484_s7  ;;  %s572_s12 = smov [#allocation7]  }
  0x3d   : > { %s488_s8 = sshll.u32 %s572_s12, 4  ;;  %s489_s8 = int_to_ptr.vmem [resolvable:$false] %s488_s8 }
  0x3e   : > { %v222_v5 = vadd.f32 %v221_v4, %v216_v0  ;;  %p486_p0 = pnand %p485_p8, %p639_p9  ;;  %s490_s30 = scalar_lea.vmem %s489_s8, 256 }
  0x3f   : > { %p491_p13 = scmp.lt.s32.totalorder %s710_s19, %s489_s8  ;;  %p492_p5 = scmp.lt.s32.totalorder %s490_s30, %s484_s7 }
  0x40   : > { %v223_v6 = vsel %vm219_vm0, %v222_v5, %v216_v0  ;;  %p487_p3 = pneg %p486_p0 }
  0x41   : > { %225 = vst.msk [vmem:[%s215_s18] sm:$0xff] %vm224_vm1, %v223_v6  ;;  %p493_p12 = por %p492_p5, %p491_p13 }
  0x43   : > { %p494_p6 = pnand %p493_p12, %p487_p3 }
  0x45   : > { %497 = shalt.err (!%p494_p6)
}
  0x46   : > { %s498_s4 = scalar_lea.hbm %s239_s21, 128  ;;  %s502_s26 = scalar_lea.hbm %s757_s2, 256 }
  0x47   : > { %p499_p7 = scmp.ne.s32.totalorder %s239_s21, %s498_s4  ;;  %p503_p4 = scmp.lt.s32.totalorder %s239_s21, %s757_s2 }
  0x48   : > { %p504_p10 = scmp.lt.s32.totalorder %s502_s26, %s498_s4 }
  0x49   : > { %p500_p1 = pnand %p499_p7, %p639_p9 }
  0x4a   : > { %p505_p8 = por %p504_p10, %p503_p4 }
  0x4b   : > { %p501_p2 = pneg %p500_p1 }
  0x4d   : > { %p506_p0 = pnand %p505_p8, %p501_p2 }
  0x4f   : > { %509 = shalt.err (!%p506_p0)
}
  0x50   : > { %365 = dma.vmem_to_hbm [thread:$0]  (%p639_p9), %s710_s19, 128, %s239_s21, %s227_s3  }
  0x51 PF: > { %s253_s5 = sand.u32 1, %s548_s9   ;;  %p764_p3 = scmp.ge.s32.totalorder %s568_s14, 2 }
  0x52   : > { %s254_s16 = scalar_lea.sflag [#allocation4], %s253_s5 }
  0x53   : > { %p375_p13 = pnand %p764_p3, %p646_p11 }
  0x55   : > { %p376_p5 = pneg %p375_p13 }
  0x57   : > { %543 = dma.done.wait (%p376_p5), %s254_s16, 128  }
  0x58   : > { %545 = vsyncadd (%p376_p5), %s254_s16, 4294967168  ;;  %s21_s14 = sadd.s32 1, %s568_s14   ;;  %s765_s9 = smov %s552_s10 }
  0x59   : > { %p18_p12 = scmp.ge.s32.totalorder %s21_s14, 4   ;;  %s766_s10 = smov %s556_s11 }
  0x5a   : > { %s767_s11 = smov %s644_s23  ;;  %s768_s12 = smov %s564_s13 }
  0x5b   : > { %s769_s13 = smov %s771_s17  ;;  %20 = sbr.rel (!%p18_p12) target bundleno = 8 (0x8), region = 86 }
  0x60   :  { %259 = vsyncpa [#allocation3], 1 }
  0x61   :  { %261 = vsyncpa [#allocation3 + $0x1], 1 }
  0x62   :  { %262 = vsyncpa [#allocation6], 1 }
  0x63   :  { %264 = vsyncpa [#allocation6 + $0x1], 1 }
  0x64   :  { %265 = vsyncpa [#allocation4], 1 }
  0x65   :  { %267 = vsyncpa [#allocation4 + $0x1], 1 }

</bundles_post_ra>
